<compile_context>
chip_gen: v7x
topology: tpu7x:2x2x1
jax: 0.10.0
libtpu: 0.0.40
codegen_flags: <defaults>
</compile_context>

<pallas_src>
import functools
import math

import jax
import jax.numpy as jnp
from jax.experimental import pallas as pl
from jax.experimental.pallas import tpu as pltpu


def _pick_batch_tile(nrows, bytes_per_row, target_block_bytes):
    """Batch-tile rows per block: single block for small problems, otherwise
    ~target_block_bytes blocks whose row count is a multiple of 8 (sublane
    alignment of the block's second-to-last dim) or the full batch."""
    if nrows * bytes_per_row <= target_block_bytes:
        return int(nrows)
    tb = target_block_bytes // max(1, bytes_per_row)
    tb = (tb // 8) * 8
    if tb < 8:
        tb = 8
    if tb >= nrows:
        return int(nrows)
    return int(tb)


def _rsoftmax_softmax_kernel(x_ref, o_ref, *, radix, cardinality, rest):
    """Softmax over the radix groups with the radix<->cardinality transpose.

    x_ref: (TB, total) in the natural order   (c, r, j)  -> lane (c*radix + r)*rest + j
    o_ref: (TB, total) in the transposed order (r, c, j) -> lane (r*cardinality + c)*rest + j
    radix / cardinality are tiny static constants, so the loops fully unroll.
    """
    acc = jnp.float32

    for c in range(cardinality):
        base = c * radix * rest

        def x_slice(r, _base=base):
            # Static lane-offset slice of the dense input block (VMEM load).
            return x_ref[:, _base + r * rest: _base + (r + 1) * rest].astype(acc)

        # Running max over the radix groups (VPU elementwise, unrolled).
        m = x_slice(0)
        for r in range(1, radix):
            m = jnp.maximum(m, x_slice(r))

        # Normalizer: sum of exp (EUP exp + VPU add); exp slabs not retained.
        s = jnp.exp(x_slice(0) - m)
        for r in range(1, radix):
            s = s + jnp.exp(x_slice(r) - m)
        inv = pl.reciprocal(s, approx=False)   # exact; EUP slot

        # Store loop: recompute exp(x - m) (EUP, ~free) and write each radix
        # result to its transposed lane offset inside the dense output block.
        for r in range(radix):
            off = (r * cardinality + c) * rest
            val = jnp.exp(x_slice(r) - m) * inv
            o_ref[:, off: off + rest] = val.astype(o_ref.dtype)


def _rsoftmax_sigmoid_kernel(x_ref, o_ref):
    x = x_ref[...].astype(jnp.float32)
    y = pl.reciprocal(1.0 + jnp.exp(-x), approx=False)   # EUP exp + EUP recip
    o_ref[...] = y.astype(o_ref.dtype)


def rsoftmax(x, radix, cardinality, *, target_block_bytes=4 * 1024 * 1024):
    """JAX/Pallas equivalent of rSoftMax.forward.

    x: (B, C, H, W) (NCHW, like the PyTorch module)
    returns:
      radix > 1  -> (B, C*H*W)   softmax over the radix groups, in the
                                  transposed (radix, cardinality, rest) order
      radix == 1 -> (B, C, H, W) elementwise sigmoid, same shape
    """
    batch = x.shape[0]
    total = math.prod(x.shape[1:])
    bytes_per_row = total * jnp.dtype(x.dtype).itemsize

    if radix > 1:
        if total % (radix * cardinality) != 0:
            raise ValueError(
                f"C*H*W={total} not divisible by radix*cardinality="
                f"{radix * cardinality}")
        rest = total // (radix * cardinality)

        xin = x.reshape(batch, total)                  # contiguous, free
        tb = _pick_batch_tile(batch, bytes_per_row, target_block_bytes)
        grid = (pl.cdiv(batch, tb),)

        kernel = functools.partial(_rsoftmax_softmax_kernel,
                                   radix=radix, cardinality=cardinality,
                                   rest=rest)
        out = pl.pallas_call(
            kernel,
            out_shape=jax.ShapeDtypeStruct((batch, total), x.dtype),
            grid=grid,
            in_specs=[pl.BlockSpec((tb, total), lambda i: (i, 0))],
            out_specs=pl.BlockSpec((tb, total), lambda i: (i, 0)),
            compiler_params=pltpu.CompilerParams(
                dimension_semantics=("parallel",),
                vmem_limit_bytes=32 * 1024 * 1024),
        )(xin)
        # Already in the transposed element order -> matches PyTorch's
        # reshape(batch, -1) of the transposed tensor with no extra reshape.
        return out
    else:
        flat = x.reshape(batch, total)
        tb = _pick_batch_tile(batch, bytes_per_row, target_block_bytes)
        grid = (pl.cdiv(batch, tb),)

        out = pl.pallas_call(
            _rsoftmax_sigmoid_kernel,
            out_shape=jax.ShapeDtypeStruct((batch, total), x.dtype),
            grid=grid,
            in_specs=[pl.BlockSpec((tb, total), lambda i: (i, 0))],
            out_specs=pl.BlockSpec((tb, total), lambda i: (i, 0)),
            compiler_params=pltpu.CompilerParams(
                dimension_semantics=("parallel",),
                vmem_limit_bytes=32 * 1024 * 1024),
        )(flat)
        return out.reshape(x.shape)


def _rsoftmax_ref(x, radix, cardinality):
    """Pure-JAX reference mirroring the PyTorch semantics."""
    batch = x.shape[0]
    if radix > 1:
        xr = x.reshape(batch, cardinality, radix, -1)
        xr = jnp.transpose(xr, (0, 2, 1, 3))
        xr = jax.nn.softmax(xr.astype(jnp.float32), axis=1).astype(x.dtype)
        return xr.reshape(batch, -1)
    return jax.nn.sigmoid(x.astype(jnp.float32)).astype(x.dtype)


if __name__ == "__main__":
    key = jax.random.PRNGKey(0)
    k1, k2, k3, k4, k5 = jax.random.split(key, 5)

    radix, cardinality = 2, 2

    # 1) pooled attention logits (H = W = 1): rest = 16 (sub-lane-width groups)
    x = jax.random.normal(k1, (4, 64, 1, 1), dtype=jnp.float32)
    out = jax.block_until_ready(rsoftmax(x, radix, cardinality))
    ref = _rsoftmax_ref(x, radix, cardinality)
    assert out.shape == (4, 64), out.shape
    assert jnp.allclose(out, ref, atol=1e-5, rtol=1e-5), \
        float(jnp.max(jnp.abs(out - ref)))

    # 2) spatial extent, bf16 in/out: rest = 128 (lane-aligned groups)
    x2 = jax.random.normal(k2, (2, 32, 4, 4), dtype=jnp.bfloat16)
    out2 = jax.block_until_ready(rsoftmax(x2, radix, cardinality))
    ref2 = _rsoftmax_ref(x2, radix, cardinality)
    assert out2.shape == (2, 512), out2.shape
    assert out2.dtype == jnp.bfloat16
    assert jnp.allclose(out2.astype(jnp.float32), ref2.astype(jnp.float32),
                        atol=1e-2, rtol=1e-2)

    # 3) multi-block grid + ragged last block (force a small block size)
    x3 = jax.random.normal(k3, (20, 64, 1, 1), dtype=jnp.float32)
    out3 = jax.block_until_ready(
        rsoftmax(x3, radix, cardinality, target_block_bytes=2048))
    ref3 = _rsoftmax_ref(x3, radix, cardinality)
    assert out3.shape == (20, 64), out3.shape
    assert jnp.allclose(out3, ref3, atol=1e-5, rtol=1e-5)

    # 4) radix == 1: plain elementwise sigmoid, shape preserved
    x4 = jax.random.normal(k4, (4, 32, 1, 1), dtype=jnp.float32)
    out4 = jax.block_until_ready(rsoftmax(x4, 1, cardinality))
    ref4 = _rsoftmax_ref(x4, 1, cardinality)
    assert out4.shape == x4.shape, out4.shape
    assert jnp.allclose(out4, ref4, atol=1e-5, rtol=1e-5)

    # 5) radix == 1, multi-block grid + ragged last block
    x5 = jax.random.normal(k5, (20, 32, 1, 1), dtype=jnp.float32)
    out5 = jax.block_until_ready(
        rsoftmax(x5, 1, cardinality, target_block_bytes=1024))
    ref5 = _rsoftmax_ref(x5, 1, cardinality)
    assert out5.shape == x5.shape, out5.shape
    assert jnp.allclose(out5, ref5, atol=1e-5, rtol=1e-5)

    print("KERNEL_OK")
</pallas_src>

<mosaic_0001>
module attributes {stable_mosaic.version = 11 : i64} {
  func.func @_rsoftmax_softmax_kernel(%arg0: i32, %arg1: memref<4x64xf32, #tpu.memory_space<vmem>>, %arg2: memref<4x64xf32, #tpu.memory_space<vmem>>) attributes {dimension_semantics = [#tpu.dimension_semantics<parallel>], iteration_bounds = array<i64: 1>, scalar_prefetch = 0 : i64, scratch_operands = 0 : i64, tpu.core_type = #tpu.core_type<tc>, window_params = [{transform_indices = @transform_0, window_bounds = array<i64: 4, 64>}, {transform_indices = @transform_1, window_bounds = array<i64: 4, 64>}]} {
    %c0 = arith.constant 0 : index
    %c0_0 = arith.constant 0 : index
    %0 = vector.load %arg1[%c0, %c0_0] : memref<4x64xf32, #tpu.memory_space<vmem>>, vector<4x16xf32>
    %c0_1 = arith.constant 0 : index
    %c16 = arith.constant 16 : index
    %1 = vector.load %arg1[%c0_1, %c16] : memref<4x64xf32, #tpu.memory_space<vmem>>, vector<4x16xf32>
    %2 = arith.maximumf %0, %1 : vector<4x16xf32>
    %c0_2 = arith.constant 0 : index
    %c0_3 = arith.constant 0 : index
    %3 = vector.load %arg1[%c0_2, %c0_3] : memref<4x64xf32, #tpu.memory_space<vmem>>, vector<4x16xf32>
    %4 = arith.subf %3, %2 : vector<4x16xf32>
    %5 = math.exp %4 : vector<4x16xf32>
    %c0_4 = arith.constant 0 : index
    %c16_5 = arith.constant 16 : index
    %6 = vector.load %arg1[%c0_4, %c16_5] : memref<4x64xf32, #tpu.memory_space<vmem>>, vector<4x16xf32>
    %7 = arith.subf %6, %2 : vector<4x16xf32>
    %8 = math.exp %7 : vector<4x16xf32>
    %9 = arith.addf %5, %8 : vector<4x16xf32>
    %10 = tpu.reciprocal %9 : vector<4x16xf32> -> vector<4x16xf32>
    %c0_6 = arith.constant 0 : index
    %c0_7 = arith.constant 0 : index
    %11 = vector.load %arg1[%c0_6, %c0_7] : memref<4x64xf32, #tpu.memory_space<vmem>>, vector<4x16xf32>
    %12 = arith.subf %11, %2 : vector<4x16xf32>
    %13 = math.exp %12 : vector<4x16xf32>
    %14 = arith.mulf %13, %10 : vector<4x16xf32>
    %c0_8 = arith.constant 0 : index
    %c0_9 = arith.constant 0 : index
    %15 = vector.load %arg2[%c0_8, %c0_9] : memref<4x64xf32, #tpu.memory_space<vmem>>, vector<4x16xf32>
    tpu.vector_store %arg2[%c0_8, %c0_9], %14 {strides = array<i32>} : memref<4x64xf32, #tpu.memory_space<vmem>>, vector<4x16xf32>,
    %c0_10 = arith.constant 0 : index
    %c16_11 = arith.constant 16 : index
    %16 = vector.load %arg1[%c0_10, %c16_11] : memref<4x64xf32, #tpu.memory_space<vmem>>, vector<4x16xf32>
    %17 = arith.subf %16, %2 : vector<4x16xf32>
    %18 = math.exp %17 : vector<4x16xf32>
    %19 = arith.mulf %18, %10 : vector<4x16xf32>
    %c0_12 = arith.constant 0 : index
    %c32 = arith.constant 32 : index
    %20 = vector.load %arg2[%c0_12, %c32] : memref<4x64xf32, #tpu.memory_space<vmem>>, vector<4x16xf32>
    tpu.vector_store %arg2[%c0_12, %c32], %19 {strides = array<i32>} : memref<4x64xf32, #tpu.memory_space<vmem>>, vector<4x16xf32>,
    %c0_13 = arith.constant 0 : index
    %c32_14 = arith.constant 32 : index
    %21 = vector.load %arg1[%c0_13, %c32_14] : memref<4x64xf32, #tpu.memory_space<vmem>>, vector<4x16xf32>
    %c0_15 = arith.constant 0 : index
    %c48 = arith.constant 48 : index
    %22 = vector.load %arg1[%c0_15, %c48] : memref<4x64xf32, #tpu.memory_space<vmem>>, vector<4x16xf32>
    %23 = arith.maximumf %21, %22 : vector<4x16xf32>
    %c0_16 = arith.constant 0 : index
    %c32_17 = arith.constant 32 : index
    %24 = vector.load %arg1[%c0_16, %c32_17] : memref<4x64xf32, #tpu.memory_space<vmem>>, vector<4x16xf32>
    %25 = arith.subf %24, %23 : vector<4x16xf32>
    %26 = math.exp %25 : vector<4x16xf32>
    %c0_18 = arith.constant 0 : index
    %c48_19 = arith.constant 48 : index
    %27 = vector.load %arg1[%c0_18, %c48_19] : memref<4x64xf32, #tpu.memory_space<vmem>>, vector<4x16xf32>
    %28 = arith.subf %27, %23 : vector<4x16xf32>
    %29 = math.exp %28 : vector<4x16xf32>
    %30 = arith.addf %26, %29 : vector<4x16xf32>
    %31 = tpu.reciprocal %30 : vector<4x16xf32> -> vector<4x16xf32>
    %c0_20 = arith.constant 0 : index
    %c32_21 = arith.constant 32 : index
    %32 = vector.load %arg1[%c0_20, %c32_21] : memref<4x64xf32, #tpu.memory_space<vmem>>, vector<4x16xf32>
    %33 = arith.subf %32, %23 : vector<4x16xf32>
    %34 = math.exp %33 : vector<4x16xf32>
    %35 = arith.mulf %34, %31 : vector<4x16xf32>
    %c0_22 = arith.constant 0 : index
    %c16_23 = arith.constant 16 : index
    %36 = vector.load %arg2[%c0_22, %c16_23] : memref<4x64xf32, #tpu.memory_space<vmem>>, vector<4x16xf32>
    tpu.vector_store %arg2[%c0_22, %c16_23], %35 {strides = array<i32>} : memref<4x64xf32, #tpu.memory_space<vmem>>, vector<4x16xf32>,
    %c0_24 = arith.constant 0 : index
    %c48_25 = arith.constant 48 : index
    %37 = vector.load %arg1[%c0_24, %c48_25] : memref<4x64xf32, #tpu.memory_space<vmem>>, vector<4x16xf32>
    %38 = arith.subf %37, %23 : vector<4x16xf32>
    %39 = math.exp %38 : vector<4x16xf32>
    %40 = arith.mulf %39, %31 : vector<4x16xf32>
    %c0_26 = arith.constant 0 : index
    %c48_27 = arith.constant 48 : index
    %41 = vector.load %arg2[%c0_26, %c48_27] : memref<4x64xf32, #tpu.memory_space<vmem>>, vector<4x16xf32>
    tpu.vector_store %arg2[%c0_26, %c48_27], %40 {strides = array<i32>} : memref<4x64xf32, #tpu.memory_space<vmem>>, vector<4x16xf32>,
    return
  }
  func.func @transform_0(%arg0: i32) -> (i32, i32) {
    %c0_i32 = arith.constant 0 : i32
    %c0_i32_0 = arith.constant 0 : i32
    return %arg0, %c0_i32 : i32, i32
  }
  func.func @transform_1(%arg0: i32) -> (i32, i32) {
    %c0_i32 = arith.constant 0 : i32
    %c0_i32_0 = arith.constant 0 : i32
    return %arg0, %c0_i32 : i32, i32
  }
}

</mosaic_0001>

<bundles_post_ra>
// kernel: tpu_custom_call.1
= control target key start
LH: loop header
LB: loop body
LE: loop exit
PB: predicated region body
PF: predicated region fallthrough
CT: control target
= control target key end

     0   :  { %6 = vsyncpa [#allocation3], 0  ;;  %s232_s0 = inlined_call_operand.hbm [shape: f32[4,64], index: 0, kind: input, shape index: {}]   ;;  %s233_s1 = inlined_call_operand.hbm [shape: f32[4,64], index: 1, kind: output, shape index: {}]  }
   0x1   :  { %7 = vsyncpa [#allocation4], 0  ;;  %s184_s6 = smov [#allocation2]   ;;  %s136_s10 = scalar_lea.hbm %s232_s0, 64 }
   0x2   :  { %s14_s7 = sshll.u32 %s184_s6, 4  ;;  %p137_p0 = scmp.ne.s32.totalorder %s232_s0, %s136_s10  ;;  %s15_s7 = int_to_ptr.vmem [resolvable:$true] %s14_s7 }
   0x3   :  { %p140_p1 = scmp.lt.u32.totalorder %s136_s10, %s232_s0 }
   0x5   :  { %p142_p2 = pnand %p140_p1, %p137_p0 }
   0x7   :  { %145 = shalt.err (!%p142_p2)
}
   0x8   :  { %s146_s15 = scalar_lea.vmem %s15_s7, 64  ;;  %p151_p4 = scmp.lt.s32.totalorder %s15_s7, %s15_s7 }
   0x9   :  { %p147_p3 = scmp.ne.s32.totalorder %s15_s7, %s146_s15  ;;  %p152_p5 = scmp.lt.s32.totalorder %s146_s15, %s146_s15 }
   0xb   :  { %p153_p6 = por %p152_p5, %p151_p4 }
   0xd   :  { %p154_p7 = pnand %p153_p6, %p147_p3 }
   0xf   :  { %157 = shalt.err (!%p154_p7)
}
  0x10   :  { %17 = dma.hbm_to_vmem [thread:$0]  %s232_s0, 64, %s15_s7, [#allocation3]  }
  0x11   :  { %180 = dma.done.wait [#allocation3], 64  }
  0x12   :  { %181 = vsyncadd [#allocation3], 4294967232  ;;  %v21_v0 = vld [vmem:[#allocation2] sm:$0xf]  ;;  %s185_s18 = smov 112   ;;  %s186_s19 = smov 16  }
  0x13   :  { %23 = vrot.lane.b32.xlu0 %v21_v0, %s185_s18  ;;  %v61_v1 = vld [vmem:[#allocation2] sm:$0xf]  ;;  %vm44_vm0 = vcmask 125952   ;;  %vm59_vm1 = vcmask 388352   ;;  %s187_s0 = smov [#allocation5]   ;;  %vm88_vm2 = vcmask 257152  }
  0x14   :  { %v46_v28 = vld [vmem:[#allocation2] sm:$0xf]  ;;  %s107_s20 = sshll.u32 %s187_s0, 4  ;;  %vm99_vm3 = vcmask 519552   ;;  %s108_s20 = int_to_ptr.vmem [resolvable:$true] %s107_s20 }
  0x15   :  { %v90_v34 = vld [vmem:[#allocation2] sm:$0xf]  ;;  %s158_s21 = scalar_lea.vmem %s108_s20, 64  ;;  %p163_p9 = scmp.lt.s32.totalorder %s108_s20, %s108_s20 }
  0x16   :  { %p159_p8 = scmp.ne.s32.totalorder %s108_s20, %s158_s21  ;;  %p164_p10 = scmp.lt.s32.totalorder %s158_s21, %s158_s21 }
  0x17   :  { %63 = vrot.lane.b32.xlu0 %v61_v1, %s185_s18 }
  0x18   :  { %p165_p11 = por %p164_p10, %p163_p9 }
  0x1a   :  { %p166_p12 = pnand %p165_p11, %p159_p8 }
  0x85   :  { %v24_v2 = vpop.permute.xlu0 %23 }
  0x86   :  { %v26_v3 = vmax.f32 %v21_v0, %v24_v2 }
  0x88   :  { %31 = vrot.lane.b32.xlu1 %v26_v3, %s186_s19  ;;  %v27_v14 = vsub.f32 %v21_v0, %v26_v3 }
  0x89   :  { %v64_v4 = vpop.permute.xlu0 %63 }
  0x8a   :  { %v66_v5 = vmax.f32 %v61_v1, %v64_v4  ;;  %v28_v15 = vmul.f32 1.442695, %v27_v14 }
  0x8c   :  { %71 = vrot.lane.b32.xlu1 %v66_v5, %s186_s19  ;;  %v67_v16 = vsub.f32 %v61_v1, %v66_v5 }
  0x8e   :  { %v68_v17 = vmul.f32 1.442695, %v67_v16 }
  0xfa   :  { %v32_v6 = vpop.permute.xlu1 %31 }
  0xfb   :  { %v34_v7 = vsub.f32 %v21_v0, %v32_v6  ;;  %v47_v29 = vsub.f32 %v46_v28, %v32_v6 }
  0xfd   :  { %v35_v8 = vmul.f32 1.442695, %v34_v7  ;;  %v48_v30 = vmul.f32 1.442695, %v47_v29 }
  0xfe   :  { %v72_v9 = vpop.permute.xlu1 %71 }
  0xff   :  { %120 = vpow2.f32 %v35_v8  ;;  %v74_v10 = vsub.f32 %v61_v1, %v72_v9  ;;  %v91_v35 = vsub.f32 %v90_v34, %v72_v9 }
 0x101   :  { %v75_v11 = vmul.f32 1.442695, %v74_v10  ;;  %v92_v36 = vmul.f32 1.442695, %v91_v35 }
 0x103   :  { %122 = vpow2.f32 %v75_v11 }
 0x104   :  { %124 = vpow2.f32 %v28_v15 }
 0x105   :  { %126 = vpow2.f32 %v68_v17 }
 0x109   :  { %v121_v12 = vpop.eup %120 }
 0x10a   :  { %38 = vrot.lane.b32.xlu0 %v121_v12, %s185_s18 }
 0x10d   :  { %v123_v13 = vpop.eup %122 }
 0x10e   :  { %78 = vrot.lane.b32.xlu1 %v123_v13, %s185_s18  ;;  %v125_v18 = vpop.eup %124 }
 0x10f   :  { %v127_v21 = vpop.eup %126 }
 0x17c   :  { %v39_v19 = vpop.permute.xlu0 %38 }
 0x17d   :  { %v41_v20 = vadd.f32 %v125_v18, %v39_v19 }
 0x17f   :  { %128 = vrcp.f32 %v41_v20 }
 0x180   :  { %v79_v22 = vpop.permute.xlu1 %78 }
 0x181   :  { %v81_v23 = vadd.f32 %v127_v21, %v79_v22 }
 0x183   :  { %130 = vrcp.f32 %v81_v23 }
 0x184   :  { %132 = vpow2.f32 %v48_v30 }
 0x185   :  { %134 = vpow2.f32 %v92_v36 }
 0x189   :  { %v129_v24 = vpop.eup %128 }
 0x18a   :  { %51 = vrot.lane.b32.xlu0 %v129_v24, %s186_s19  ;;  %v43_v25 = vmul.f32 %v129_v24, %v125_v18 }
 0x18c   :  { %45 = vst.msk [vmem:[#allocation5] sm:$0xf] %vm44_vm0, %v43_v25 }
 0x18d   :  { %v131_v26 = vpop.eup %130 }
 0x18e   :  { %95 = vrot.lane.b32.xlu0 %v131_v26, %s186_s19  ;;  %v83_v27 = vmul.f32 %v131_v26, %v127_v21  ;;  %v133_v31 = vpop.eup %132 }
 0x18f   :  { %v135_v39 = vpop.eup %134 }
 0x1fc   :  { %v52_v32 = vpop.permute.xlu0 %51 }
 0x1fd   :  { %v54_v33 = vmul.f32 %v133_v31, %v52_v32 }
 0x1ff   :  { %56 = vrot.lane.b32.xlu1 %v54_v33, %s186_s19 }
 0x200   :  { %v96_v38 = vpop.permute.xlu0 %95 }
 0x201   :  { %v98_v40 = vmul.f32 %v135_v39, %v96_v38 }
 0x203   :  { %85 = vrot.lane.b32.xlu1 %v83_v27, %s185_s18 }
 0x271   :  { %v57_v37 = vpop.permute.xlu1 %56 }
 0x272   :  { %60 = vst.msk [vmem:[#allocation5] sm:$0xf] %vm59_vm1, %v57_v37 }
 0x275   :  { %v86_v41 = vpop.permute.xlu1 %85 }
 0x276   :  { %89 = vst.msk [vmem:[#allocation5] sm:$0xf] %vm88_vm2, %v86_v41 }
 0x277   :  { %100 = vst.msk [vmem:[#allocation5] sm:$0xf] %vm99_vm3, %v98_v40 }
 0x278   :  { %169 = shalt.err (!%p166_p12)
}
 0x279   :  { %s170_s24 = scalar_lea.hbm %s233_s1, 64 }
 0x27a   :  { %p171_p13 = scmp.ne.s32.totalorder %s233_s1, %s170_s24  ;;  %p174_p0 = scmp.lt.u32.totalorder %s170_s24, %s233_s1 }
 0x27c   :  { %p176_p1 = pnand %p174_p0, %p171_p13 }
 0x27e   :  { %179 = shalt.err (!%p176_p1)
}
 0x27f   :  { %110 = dma.vmem_to_hbm [thread:$0]  %s108_s20, 64, %s233_s1, [#allocation4]  }
 0x280   :  { %182 = dma.done.wait [#allocation4], 64  }
 0x281   :  { %183 = vsyncadd [#allocation4], 4294967232 }
 0x282   :  { %114 = vsyncpa [#allocation3], 1 }
 0x283   :  { %115 = vsyncpa [#allocation4], 1 }

</bundles_post_ra>
